<compile_context>
chip_gen: v7x
topology: tpu7x:2x2x1
jax: 0.10.0
libtpu: 0.0.40
codegen_flags: <defaults>
</compile_context>

<pallas_src>
import jax
import jax.numpy as jnp
from jax.experimental import pallas as pl
from jax.experimental.pallas import tpu as pltpu


# ----------------------------------------------------------------------------
# Fused decoder-step kernel
# ----------------------------------------------------------------------------
def _make_decoder_step_kernel(num_layers: int):
    """Kernel factory (num_layers is a compile-time constant)."""

    def kernel(tok_ref, state_ref, emb_ref, *rest):
        lstm_refs = rest[:2 * num_layers]                  # w0, b0, w1, b1, ...
        fcw_ref, fcb_ref, pred_ref, new_state_ref = rest[2 * num_layers:]

        B = state_ref.shape[0]
        vocab = emb_ref.shape[0]
        H = lstm_refs[1].shape[1] // 4                     # bias is (1, 4H)

        # ---- embedding gather: one-hot (built from SMEM token ids) @ table --
        col_ids = jax.lax.broadcasted_iota(jnp.int32, (1, vocab), 1)
        onehot = jnp.concatenate(
            [(col_ids == tok_ref[b]).astype(jnp.float32) for b in range(B)],
            axis=0)                                        # (B, vocab)
        x = jnp.dot(onehot, emb_ref[...],
                    preferred_element_type=jnp.float32)    # (B, E)
        # dropout(embedding) == identity (inference mode)

        # ---- unpack lane-dense state slab [h_0..h_{L-1} | c_0..c_{L-1}] -----
        state = state_ref[...]
        h = [state[:, l * H:(l + 1) * H] for l in range(num_layers)]
        c = [state[:, (num_layers + l) * H:(num_layers + l + 1) * H]
             for l in range(num_layers)]

        layer_in = x
        new_h, new_c = [], []
        for l in range(num_layers):
            w = lstm_refs[2 * l][...]                      # (in+H, 4H)
            b = lstm_refs[2 * l + 1][...]                  # (1, 4H)
            xh = jnp.concatenate([layer_in, h[l]], axis=-1)
            gates = jnp.dot(xh, w, preferred_element_type=jnp.float32) + b
            # PyTorch gate order: i, f, g, o.  Two full-width EUP passes,
            # then static lane-group selects.
            sig = jax.nn.sigmoid(gates)
            th = jnp.tanh(gates)
            i_g = sig[:, 0 * H:1 * H]
            f_g = sig[:, 1 * H:2 * H]
            g_g = th[:, 2 * H:3 * H]
            o_g = sig[:, 3 * H:4 * H]
            c_new = f_g * c[l] + i_g * g_g
            h_new = o_g * jnp.tanh(c_new)
            new_h.append(h_new)
            new_c.append(c_new)
            layer_in = h_new                               # inter-layer dropout = identity

        # ---- fc projection (lane-dense V output) ----------------------------
        pred_ref[...] = (jnp.dot(layer_in, fcw_ref[...],
                                 preferred_element_type=jnp.float32)
                         + fcb_ref[...])

        # ---- single lane-dense state store -----------------------------------
        new_state_ref[...] = jnp.concatenate(new_h + new_c, axis=-1)

    return kernel


_SMEM = pl.BlockSpec(memory_space=pltpu.MemorySpace.SMEM)
_VMEM = pl.BlockSpec(memory_space=pltpu.MemorySpace.VMEM)


def decoder_step(params, tokens, state):
    """One fused decoder step.

    tokens: (B,) int32 token ids
    state:  (B, 2*num_layers*H) float32 packed [h | c] slab
    returns (predictions (B, V), new packed state) — state updated in place
    via input_output_aliases.
    """
    num_layers = sum(1 for k in params if k.startswith("w_l"))
    B = state.shape[0]
    V = params["fc_w_t"].shape[1]

    inputs = [tokens, state, params["embedding"]]
    for layer in range(num_layers):
        inputs += [params[f"w_l{layer}"], params[f"bias_l{layer}"]]
    inputs += [params["fc_w_t"], params["fc_b"]]

    return pl.pallas_call(
        _make_decoder_step_kernel(num_layers),
        out_shape=(jax.ShapeDtypeStruct((B, V), jnp.float32),
                   jax.ShapeDtypeStruct(state.shape, jnp.float32)),
        in_specs=[_SMEM] + [_VMEM] * (len(inputs) - 1),
        out_specs=(_VMEM, _VMEM),
        input_output_aliases={1: 1},          # state slab aliased in -> out
    )(*inputs)


# ----------------------------------------------------------------------------
# PyTorch-layout interface (matches Decoder.forward(x, hidden, cell))
# ----------------------------------------------------------------------------
def pack_state(hidden, cell):
    """(L,B,H) x2 -> (B, 2*L*H) lane-dense slab [h_0..h_{L-1} | c_0..c_{L-1}]."""
    L, B, H = hidden.shape
    h_slab = jnp.moveaxis(hidden, 0, 1).reshape(B, L * H)
    c_slab = jnp.moveaxis(cell, 0, 1).reshape(B, L * H)
    return jnp.concatenate([h_slab, c_slab], axis=-1)


def unpack_state(state, num_layers, hidden_size):
    B = state.shape[0]
    LH = num_layers * hidden_size
    h = jnp.moveaxis(state[:, :LH].reshape(B, num_layers, hidden_size), 1, 0)
    c = jnp.moveaxis(state[:, LH:].reshape(B, num_layers, hidden_size), 1, 0)
    return h, c


def decoder_forward(params, x_tokens, hidden, cell):
    """
    x_tokens: (B,) int32 token ids
    hidden:   (num_layers, B, H) float32
    cell:     (num_layers, B, H) float32
    returns: predictions (B, V), new hidden, new cell   (PyTorch shapes)
    """
    num_layers, _, hidden_size = hidden.shape
    state = pack_state(hidden, cell)
    preds, new_state = decoder_step(params, x_tokens, state)
    new_hidden, new_cell = unpack_state(new_state, num_layers, hidden_size)
    return preds, new_hidden, new_cell


# ----------------------------------------------------------------------------
# Deterministic synthetic parameter init (PyTorch-equivalent layout, fused)
# ----------------------------------------------------------------------------
def init_params(key, input_size, embedding_size, hidden_size, output_size,
                num_layers):
    keys = jax.random.split(key, 3 + 2 * num_layers)
    k_iter = iter(keys)
    scale = 0.1

    params = {
        "embedding": scale * jax.random.normal(
            next(k_iter), (input_size, embedding_size), jnp.float32),
    }
    for layer in range(num_layers):
        in_dim = embedding_size if layer == 0 else hidden_size
        # PyTorch weight_ih (4H,in) / weight_hh (4H,H), stored stacked and
        # transposed as ((in+H), 4H) so one matmul on concat(x, h) gives gates.
        params[f"w_l{layer}"] = scale * jax.random.normal(
            next(k_iter), (in_dim + hidden_size, 4 * hidden_size), jnp.float32)
        # bias_ih + bias_hh folded into one (1, 4H) row.
        params[f"bias_l{layer}"] = scale * jax.random.normal(
            next(k_iter), (1, 4 * hidden_size), jnp.float32)

    # fc: PyTorch weight (V, H); store transpose (H, V).
    params["fc_w_t"] = scale * jax.random.normal(
        next(k_iter), (hidden_size, output_size), jnp.float32)
    params["fc_b"] = scale * jax.random.normal(
        next(k_iter), (1, output_size), jnp.float32)
    return params


if __name__ == "__main__":
    # Small shapes consistent with the module's forward.
    batch = 8
    input_size = 50          # decoder-side vocab (embedding rows)
    embedding_size = 32
    hidden_size = 32         # 4H = 128 lanes; 2*L*H = 128-lane state slab
    output_size = 256        # lane-dense synthetic stand-in for len(english_vocab)
    num_layers = 2

    key = jax.random.PRNGKey(0)
    k_p, k_x, k_h, k_c = jax.random.split(key, 4)

    params = init_params(k_p, input_size, embedding_size, hidden_size,
                         output_size, num_layers)

    x = jax.random.randint(k_x, (batch,), 0, input_size, dtype=jnp.int32)
    hidden = jax.random.normal(k_h, (num_layers, batch, hidden_size),
                               jnp.float32)
    cell = jax.random.normal(k_c, (num_layers, batch, hidden_size),
                             jnp.float32)

    fwd = jax.jit(decoder_forward)
    preds, new_hidden, new_cell = fwd(params, x, hidden, cell)
    jax.block_until_ready((preds, new_hidden, new_cell))

    assert preds.shape == (batch, output_size)
    assert new_hidden.shape == (num_layers, batch, hidden_size)
    assert new_cell.shape == (num_layers, batch, hidden_size)
    assert bool(jnp.all(jnp.isfinite(preds)))

    print("KERNEL_OK")
</pallas_src>

<mosaic_0001>
module attributes {stable_mosaic.version = 11 : i64} {
  func.func @kernel(%arg0: memref<8xi32, #tpu.memory_space<smem>>, %arg1: memref<8x128xf32, #tpu.memory_space<vmem>>, %arg2: memref<50x32xf32, #tpu.memory_space<vmem>>, %arg3: memref<64x128xf32, #tpu.memory_space<vmem>>, %arg4: memref<1x128xf32, #tpu.memory_space<vmem>>, %arg5: memref<64x128xf32, #tpu.memory_space<vmem>>, %arg6: memref<1x128xf32, #tpu.memory_space<vmem>>, %arg7: memref<32x256xf32, #tpu.memory_space<vmem>>, %arg8: memref<1x256xf32, #tpu.memory_space<vmem>>, %arg9: memref<8x256xf32, #tpu.memory_space<vmem>>, %arg10: memref<8x128xf32, #tpu.memory_space<vmem>>) attributes {dimension_semantics = [], scalar_prefetch = 0 : i64, scratch_operands = 0 : i64, tpu.core_type = #tpu.core_type<tc>} {
    %0 = tpu.iota {dimensions = array<i32: 1>} : vector<1x50xi32>
    %c0 = arith.constant 0 : index
    %1 = memref.load %arg0[%c0] : memref<8xi32, #tpu.memory_space<smem>>
    %2 = vector.broadcast %1 : i32 to vector<1x50xi32>
    %3 = arith.cmpi eq, %0, %2 : vector<1x50xi32>
    %4 = arith.extui %3 : vector<1x50xi1> to vector<1x50xi32>
    %5 = arith.sitofp %4 : vector<1x50xi32> to vector<1x50xf32>
    %c1 = arith.constant 1 : index
    %6 = memref.load %arg0[%c1] : memref<8xi32, #tpu.memory_space<smem>>
    %7 = vector.broadcast %6 : i32 to vector<1x50xi32>
    %8 = arith.cmpi eq, %0, %7 : vector<1x50xi32>
    %9 = arith.extui %8 : vector<1x50xi1> to vector<1x50xi32>
    %10 = arith.sitofp %9 : vector<1x50xi32> to vector<1x50xf32>
    %c2 = arith.constant 2 : index
    %11 = memref.load %arg0[%c2] : memref<8xi32, #tpu.memory_space<smem>>
    %12 = vector.broadcast %11 : i32 to vector<1x50xi32>
    %13 = arith.cmpi eq, %0, %12 : vector<1x50xi32>
    %14 = arith.extui %13 : vector<1x50xi1> to vector<1x50xi32>
    %15 = arith.sitofp %14 : vector<1x50xi32> to vector<1x50xf32>
    %c3 = arith.constant 3 : index
    %16 = memref.load %arg0[%c3] : memref<8xi32, #tpu.memory_space<smem>>
    %17 = vector.broadcast %16 : i32 to vector<1x50xi32>
    %18 = arith.cmpi eq, %0, %17 : vector<1x50xi32>
    %19 = arith.extui %18 : vector<1x50xi1> to vector<1x50xi32>
    %20 = arith.sitofp %19 : vector<1x50xi32> to vector<1x50xf32>
    %c4 = arith.constant 4 : index
    %21 = memref.load %arg0[%c4] : memref<8xi32, #tpu.memory_space<smem>>
    %22 = vector.broadcast %21 : i32 to vector<1x50xi32>
    %23 = arith.cmpi eq, %0, %22 : vector<1x50xi32>
    %24 = arith.extui %23 : vector<1x50xi1> to vector<1x50xi32>
    %25 = arith.sitofp %24 : vector<1x50xi32> to vector<1x50xf32>
    %c5 = arith.constant 5 : index
    %26 = memref.load %arg0[%c5] : memref<8xi32, #tpu.memory_space<smem>>
    %27 = vector.broadcast %26 : i32 to vector<1x50xi32>
    %28 = arith.cmpi eq, %0, %27 : vector<1x50xi32>
    %29 = arith.extui %28 : vector<1x50xi1> to vector<1x50xi32>
    %30 = arith.sitofp %29 : vector<1x50xi32> to vector<1x50xf32>
    %c6 = arith.constant 6 : index
    %31 = memref.load %arg0[%c6] : memref<8xi32, #tpu.memory_space<smem>>
    %32 = vector.broadcast %31 : i32 to vector<1x50xi32>
    %33 = arith.cmpi eq, %0, %32 : vector<1x50xi32>
    %34 = arith.extui %33 : vector<1x50xi1> to vector<1x50xi32>
    %35 = arith.sitofp %34 : vector<1x50xi32> to vector<1x50xf32>
    %c7 = arith.constant 7 : index
    %36 = memref.load %arg0[%c7] : memref<8xi32, #tpu.memory_space<smem>>
    %37 = vector.broadcast %36 : i32 to vector<1x50xi32>
    %38 = arith.cmpi eq, %0, %37 : vector<1x50xi32>
    %39 = arith.extui %38 : vector<1x50xi1> to vector<1x50xi32>
    %40 = arith.sitofp %39 : vector<1x50xi32> to vector<1x50xf32>
    %41 = tpu.concatenate %5, %10, %15, %20, %25, %30, %35, %40 in 0 : vector<1x50xf32>, vector<1x50xf32>, vector<1x50xf32>, vector<1x50xf32>, vector<1x50xf32>, vector<1x50xf32>, vector<1x50xf32>, vector<1x50xf32> -> vector<8x50xf32>
    %c0_0 = arith.constant 0 : index
    %c0_1 = arith.constant 0 : index
    %42 = vector.load %arg2[%c0_0, %c0_1] : memref<50x32xf32, #tpu.memory_space<vmem>>, vector<50x32xf32>
    %cst = arith.constant dense<0.000000e+00> : vector<8x32xf32>
    %43 = tpu.matmul %41, %42, %cst {dimension_numbers = #tpu.dot_dimension_numbers<[1], [0], [0], [1], [0, 0, 1, 1], [], []>} : vector<8x50xf32>, vector<50x32xf32>, vector<8x32xf32> -> vector<8x32xf32>
    %c0_2 = arith.constant 0 : index
    %c0_3 = arith.constant 0 : index
    %44 = vector.load %arg1[%c0_2, %c0_3] : memref<8x128xf32, #tpu.memory_space<vmem>>, vector<8x128xf32>
    %45 = vector.extract_strided_slice %44 {offsets = [0, 0], sizes = [8, 32], strides = [1, 1]} : vector<8x128xf32> to vector<8x32xf32>
    %46 = vector.extract_strided_slice %44 {offsets = [0, 32], sizes = [8, 32], strides = [1, 1]} : vector<8x128xf32> to vector<8x32xf32>
    %47 = vector.extract_strided_slice %44 {offsets = [0, 64], sizes = [8, 32], strides = [1, 1]} : vector<8x128xf32> to vector<8x32xf32>
    %48 = vector.extract_strided_slice %44 {offsets = [0, 96], sizes = [8, 32], strides = [1, 1]} : vector<8x128xf32> to vector<8x32xf32>
    %c0_4 = arith.constant 0 : index
    %c0_5 = arith.constant 0 : index
    %49 = vector.load %arg3[%c0_4, %c0_5] : memref<64x128xf32, #tpu.memory_space<vmem>>, vector<64x128xf32>
    %c0_6 = arith.constant 0 : index
    %c0_7 = arith.constant 0 : index
    %50 = vector.load %arg4[%c0_6, %c0_7] : memref<1x128xf32, #tpu.memory_space<vmem>>, vector<1x128xf32>
    %51 = tpu.concatenate %43, %45 in 1 : vector<8x32xf32>, vector<8x32xf32> -> vector<8x64xf32>
    %cst_8 = arith.constant dense<0.000000e+00> : vector<8x128xf32>
    %52 = tpu.matmul %51, %49, %cst_8 {dimension_numbers = #tpu.dot_dimension_numbers<[1], [0], [0], [1], [0, 0, 1, 1], [], []>} : vector<8x64xf32>, vector<64x128xf32>, vector<8x128xf32> -> vector<8x128xf32>
    %53 = vector.broadcast %50 : vector<1x128xf32> to vector<8x128xf32>
    %54 = arith.addf %52, %53 : vector<8x128xf32>
    %55 = arith.negf %54 : vector<8x128xf32>
    %56 = math.exp %55 : vector<8x128xf32>
    %cst_9 = arith.constant 1.000000e+00 : f32
    %57 = vector.broadcast %cst_9 : f32 to vector<8x128xf32>
    %58 = arith.addf %57, %56 : vector<8x128xf32>
    %59 = arith.divf %57, %58 : vector<8x128xf32>
    %60 = math.tanh %54 : vector<8x128xf32>
    %61 = vector.extract_strided_slice %59 {offsets = [0, 0], sizes = [8, 32], strides = [1, 1]} : vector<8x128xf32> to vector<8x32xf32>
    %62 = vector.extract_strided_slice %59 {offsets = [0, 32], sizes = [8, 32], strides = [1, 1]} : vector<8x128xf32> to vector<8x32xf32>
    %63 = vector.extract_strided_slice %60 {offsets = [0, 64], sizes = [8, 32], strides = [1, 1]} : vector<8x128xf32> to vector<8x32xf32>
    %64 = vector.extract_strided_slice %59 {offsets = [0, 96], sizes = [8, 32], strides = [1, 1]} : vector<8x128xf32> to vector<8x32xf32>
    %65 = arith.mulf %62, %47 : vector<8x32xf32>
    %66 = arith.mulf %61, %63 : vector<8x32xf32>
    %67 = arith.addf %65, %66 : vector<8x32xf32>
    %68 = math.tanh %67 : vector<8x32xf32>
    %69 = arith.mulf %64, %68 : vector<8x32xf32>
    %c0_10 = arith.constant 0 : index
    %c0_11 = arith.constant 0 : index
    %70 = vector.load %arg5[%c0_10, %c0_11] : memref<64x128xf32, #tpu.memory_space<vmem>>, vector<64x128xf32>
    %c0_12 = arith.constant 0 : index
    %c0_13 = arith.constant 0 : index
    %71 = vector.load %arg6[%c0_12, %c0_13] : memref<1x128xf32, #tpu.memory_space<vmem>>, vector<1x128xf32>
    %72 = tpu.concatenate %69, %46 in 1 : vector<8x32xf32>, vector<8x32xf32> -> vector<8x64xf32>
    %cst_14 = arith.constant dense<0.000000e+00> : vector<8x128xf32>
    %73 = tpu.matmul %72, %70, %cst_14 {dimension_numbers = #tpu.dot_dimension_numbers<[1], [0], [0], [1], [0, 0, 1, 1], [], []>} : vector<8x64xf32>, vector<64x128xf32>, vector<8x128xf32> -> vector<8x128xf32>
    %74 = vector.broadcast %71 : vector<1x128xf32> to vector<8x128xf32>
    %75 = arith.addf %73, %74 : vector<8x128xf32>
    %76 = arith.negf %75 : vector<8x128xf32>
    %77 = math.exp %76 : vector<8x128xf32>
    %cst_15 = arith.constant 1.000000e+00 : f32
    %78 = vector.broadcast %cst_15 : f32 to vector<8x128xf32>
    %79 = arith.addf %78, %77 : vector<8x128xf32>
    %80 = arith.divf %78, %79 : vector<8x128xf32>
    %81 = math.tanh %75 : vector<8x128xf32>
    %82 = vector.extract_strided_slice %80 {offsets = [0, 0], sizes = [8, 32], strides = [1, 1]} : vector<8x128xf32> to vector<8x32xf32>
    %83 = vector.extract_strided_slice %80 {offsets = [0, 32], sizes = [8, 32], strides = [1, 1]} : vector<8x128xf32> to vector<8x32xf32>
    %84 = vector.extract_strided_slice %81 {offsets = [0, 64], sizes = [8, 32], strides = [1, 1]} : vector<8x128xf32> to vector<8x32xf32>
    %85 = vector.extract_strided_slice %80 {offsets = [0, 96], sizes = [8, 32], strides = [1, 1]} : vector<8x128xf32> to vector<8x32xf32>
    %86 = arith.mulf %83, %48 : vector<8x32xf32>
    %87 = arith.mulf %82, %84 : vector<8x32xf32>
    %88 = arith.addf %86, %87 : vector<8x32xf32>
    %89 = math.tanh %88 : vector<8x32xf32>
    %90 = arith.mulf %85, %89 : vector<8x32xf32>
    %c0_16 = arith.constant 0 : index
    %c0_17 = arith.constant 0 : index
    %91 = vector.load %arg7[%c0_16, %c0_17] : memref<32x256xf32, #tpu.memory_space<vmem>>, vector<32x256xf32>
    %cst_18 = arith.constant dense<0.000000e+00> : vector<8x256xf32>
    %92 = tpu.matmul %90, %91, %cst_18 {dimension_numbers = #tpu.dot_dimension_numbers<[1], [0], [0], [1], [0, 0, 1, 1], [], []>} : vector<8x32xf32>, vector<32x256xf32>, vector<8x256xf32> -> vector<8x256xf32>
    %c0_19 = arith.constant 0 : index
    %c0_20 = arith.constant 0 : index
    %93 = vector.load %arg8[%c0_19, %c0_20] : memref<1x256xf32, #tpu.memory_space<vmem>>, vector<1x256xf32>
    %94 = vector.broadcast %93 : vector<1x256xf32> to vector<8x256xf32>
    %95 = arith.addf %92, %94 : vector<8x256xf32>
    %c0_21 = arith.constant 0 : index
    %c0_22 = arith.constant 0 : index
    %96 = vector.load %arg9[%c0_21, %c0_22] : memref<8x256xf32, #tpu.memory_space<vmem>>, vector<8x256xf32>
    tpu.vector_store %arg9[%c0_21, %c0_22], %95 {strides = array<i32>} : memref<8x256xf32, #tpu.memory_space<vmem>>, vector<8x256xf32>,
    %97 = tpu.concatenate %69, %90, %67, %88 in 1 : vector<8x32xf32>, vector<8x32xf32>, vector<8x32xf32>, vector<8x32xf32> -> vector<8x128xf32>
    %c0_23 = arith.constant 0 : index
    %c0_24 = arith.constant 0 : index
    %98 = vector.load %arg10[%c0_23, %c0_24] : memref<8x128xf32, #tpu.memory_space<vmem>>, vector<8x128xf32>
    tpu.vector_store %arg10[%c0_23, %c0_24], %97 {strides = array<i32>} : memref<8x128xf32, #tpu.memory_space<vmem>>, vector<8x128xf32>,
    return
  }
}

</mosaic_0001>

<bundles_post_ra>
// kernel: decoder_forward.1
= control target key start
LH: loop header
LB: loop body
LE: loop exit
PB: predicated region body
PF: predicated region fallthrough
CT: control target
= control target key end

     0   :  { %16 = vsyncpa [#allocation5], 0  ;;  %s1150_s0 = inlined_call_operand.hbm [shape: s32[8], index: 0, kind: input, shape index: {}]   ;;  %s1151_s1 = inlined_call_operand.vmem [shape: f32[8,128], index: 1, kind: input, shape index: {}, may-alias: {1,10}]   ;;  %s1152_s2 = inlined_call_operand.vmem [shape: f32[50,32], index: 2, kind: input, shape index: {}]   ;;  %s1153_s3 = inlined_call_operand.vmem [shape: f32[64,128], index: 3, kind: input, shape index: {}]   ;;  %s1154_s4 = inlined_call_operand.hbm [shape: f32[1,128], index: 4, kind: input, shape index: {}]   ;;  %s1155_s5 = inlined_call_operand.vmem [shape: f32[64,128], index: 5, kind: input, shape index: {}]   ;;  %s1156_s6 = inlined_call_operand.hbm [shape: f32[1,128], index: 6, kind: input, shape index: {}]   ;;  %s1157_s7 = inlined_call_operand.vmem [shape: f32[32,256], index: 7, kind: input, shape index: {}]   ;;  %s1158_s8 = inlined_call_operand.vmem [shape: f32[1,256], index: 8, kind: input, shape index: {}]   ;;  %s1159_s9 = inlined_call_operand.hbm [shape: f32[8,256], index: 9, kind: output, shape index: {0}]   ;;  %s1160_s10 = inlined_call_operand.vmem [shape: f32[8,128], index: 10, kind: output, shape index: {1}, may-alias: {1,10}]  }
   0x1   :  { %17 = vsyncpa [#allocation3], 0 }
   0x2   :  { %18 = vsyncpa [#allocation8], 0 }
   0x3   :  { %19 = vsyncpa [#allocation4], 0  ;;  %s760_s15 = scalar_lea.hbm %s1150_s0, 16 }
   0x4   :  { %p761_p0 = scmp.ne.s32.totalorder %s1150_s0, %s760_s15  ;;  %p764_p1 = scmp.lt.u32.totalorder %s760_s15, %s1150_s0 }
   0x6   :  { %p766_p2 = pnand %p764_p1, %p761_p0 }
   0x8   :  { %769 = shalt.err (!%p766_p2)
}
   0x9   :  { %s844_s20 = smov [#allocation2]   ;;  %s845_s23 = smov [#allocation6]  }
   0xa   :  { %27 = dma.hbm_to_smem %s1150_s0, 16, %s844_s20, [#allocation5]  }
   0xb   :  { %s40_s24 = sshll.u32 %s845_s23, 4  ;;  %s846_s25 = smov [#allocation7]   ;;  %s41_s24 = int_to_ptr.vmem [resolvable:$true] %s40_s24 }
   0xc   :  { %s52_s26 = sshll.u32 %s846_s25, 4  ;;  %s770_s29 = scalar_lea.hbm %s1154_s4, 16  ;;  %s53_s26 = int_to_ptr.vmem [resolvable:$true] %s52_s26 }
   0xd   :  { %p771_p3 = scmp.ne.s32.totalorder %s1154_s4, %s770_s29  ;;  %p774_p4 = scmp.lt.u32.totalorder %s770_s29, %s1154_s4 }
   0xf   :  { %p776_p5 = pnand %p774_p4, %p771_p3 }
  0x11   :  { %779 = shalt.err (!%p776_p5)
}
  0x12   :  { %s780_s0 = scalar_lea.vmem %s41_s24, 16  ;;  %s784_s14 = scalar_lea.vmem %s41_s24, 32 }
  0x13   :  { %p781_p6 = scmp.ne.s32.totalorder %s41_s24, %s780_s0  ;;  %p785_p7 = scmp.lt.s32.totalorder %s41_s24, %s41_s24 }
  0x14   :  { %p786_p8 = scmp.lt.s32.totalorder %s784_s14, %s780_s0 }
  0x16   :  { %p787_p9 = por %p786_p8, %p785_p7 }
  0x18   :  { %p788_p10 = pnand %p787_p9, %p781_p6 }
  0x1a   :  { %791 = shalt.err (!%p788_p10)
}
  0x1b   :  { %43 = dma.hbm_to_vmem [thread:$0]  %s1154_s4, 16, %s41_s24, [#allocation3]  }
  0x1c   :  { %s792_s19 = scalar_lea.hbm %s1156_s6, 16 }
  0x1d   :  { %p793_p11 = scmp.ne.s32.totalorder %s1156_s6, %s792_s19  ;;  %p796_p12 = scmp.lt.u32.totalorder %s792_s19, %s1156_s6 }
  0x1f   :  { %p798_p13 = pnand %p796_p12, %p793_p11 }
  0x21   :  { %801 = shalt.err (!%p798_p13)
}
  0x22   :  { %s802_s25 = scalar_lea.vmem %s53_s26, 16  ;;  %s806_s27 = scalar_lea.vmem %s53_s26, 32 }
  0x23   :  { %p803_p0 = scmp.ne.s32.totalorder %s53_s26, %s802_s25  ;;  %p807_p1 = scmp.lt.s32.totalorder %s53_s26, %s53_s26 }
  0x24   :  { %p808_p2 = scmp.lt.s32.totalorder %s806_s27, %s802_s25 }
  0x26   :  { %p809_p3 = por %p808_p2, %p807_p1 }
  0x28   :  { %p810_p4 = pnand %p809_p3, %p803_p0 }
  0x2a   :  { %813 = shalt.err (!%p810_p4)
}
  0x2b   :  { %55 = dma.hbm_to_vmem [thread:$0]  %s1156_s6, 16, %s53_s26, [#allocation8]  }
  0x2c   :  { %836 = dma.done.wait [#allocation5], 16  }
  0x2d   :  { %837 = vsyncadd [#allocation5], 4294967280 }
  0x2e   :  { %838 = dma.done.wait [#allocation3], 16  }
  0x2f   :  { %839 = vsyncadd [#allocation3], 4294967280 }
  0x30   :  { %840 = dma.done.wait [#allocation8], 16  }
  0x31   :  { %841 = vsyncadd [#allocation8], 4294967280 }
  0x32   :  { %69 = sfence }
  0x33   :  { %v126_v0 = vld [vmem:[%s1152_s2] sm:$0xff]  ;;  %v127_v1 = vld [vmem:[%s1152_s2 + $0x8] sm:$0xff]  ;;  %v128_v2 = vld [vmem:[%s1152_s2 + $0x10] sm:$0xff]  ;;  %v70_v3 = vlaneseq  ;;  %v847_v4 = vmov 0.0|0.0   ;;  %s958_s0 = sld [smem:[#allocation2]]  ;;  %s961_s14 = sld [smem:[#allocation2 + $0x1]] }
  0x34   :  { %693 = vmatprep.subr.bf16.mxu0 %v847_v4  ;;  %v694_v5 = vpack.c.bf16 %v127_v1, %v126_v0  ;;  %v129_v6 = vld [vmem:[%s1152_s2 + $0x18] sm:$0xff]  ;;  %702 = vmatprep.subr.bf16.mxu1 %v847_v4  ;;  %s963_s15 = sld [smem:[#allocation2 + $0x2]]  ;;  %v130_v8 = vld [vmem:[%s1152_s2 + $0x20] sm:$0xff]  ;;  %v131_v9 = vld [vmem:[%s1152_s2 + $0x28] sm:$0xff]  ;;  %s971_s20 = sld [smem:[#allocation2 + $0x3]]  ;;  %vm112_vm0 = vcmask 1040384  }
  0x35   :  { %v697_v7 = vpack.c.bf16 %v129_v6, %v128_v2  ;;  %v71_v10 = vand.u32 127, %v70_v3  ;;  %vm848_vm1 = vmmov 0   ;;  %v849_v11 = vmov 0.0   ;;  %s977_s21 = sld [smem:[#allocation2 + $0x4]]  ;;  %s979_s22 = sld [smem:[#allocation2 + $0x5]]  ;;  %v990_v13 = vld [vmem:[%s1151_s1] sm:$0xff] }
  0x36   :  { %695 = vmatpush3.bf16.msra.mxu0 %v694_v5  ;;  %652 = vmatprep.mubr.msk.f32.mxu0 %vm848_vm1, %v849_v11  ;;  %vm114_vm2 = vcmask 1041408   ;;  %vm116_vm3 = vcmask 1042432   ;;  %s981_s23 = sld [smem:[#allocation2 + $0x6]]  ;;  %s983_s25 = sld [smem:[#allocation2 + $0x7]]  ;;  %v700_v12 = vpack.c.bf16 %v131_v9, %v130_v8  ;;  %vm118_vm4 = vcmask 1043456   ;;  %v211_v14 = vld [vmem:[%s1153_s3] sm:$0xff] }
  0x37   :  { %696 = vmatprep.subr.bf16.mxu0 %v847_v4  ;;  %671 = vmatprep.mubr.msk.f32.mxu1 %vm848_vm1, %v849_v11  ;;  %vm120_vm5 = vcmask 1044480   ;;  %v212_v15 = vld [vmem:[%s1153_s3 + $0x8] sm:$0xff]  ;;  %vm122_vm6 = vcmask 1045504   ;;  %vm124_vm7 = vcmask 1046528   ;;  %s850_s11 = smov 32   ;;  %v213_v18 = vld [vmem:[%s1153_s3 + $0x10] sm:$0xff] }
  0x38   :  { %221 = vrot.lane.b32.xlu0 %v990_v13, %s850_s11  ;;  %v703_v17 = vpack.c.bf16 %v212_v15, %v211_v14  ;;  %v214_v19 = vld [vmem:[%s1153_s3 + $0x18] sm:$0xff]  ;;  %v215_v31 = vld [vmem:[%s1153_s3 + $0x20] sm:$0xff]  ;;  %v216_v32 = vld [vmem:[%s1153_s3 + $0x28] sm:$0xff]  ;;  %s853_s30 = smov [#allocation9]  }
  0x39   :  { %v73_v16 = vstv %s958_s0  ;;  %v78_v20 = vstv %s961_s14  ;;  %v706_v22 = vpack.c.bf16 %v214_v19, %v213_v18  ;;  %v132_v34 = vld [vmem:[%s1152_s2 + $0x30] sm:$0x3]  ;;  %v709_v42 = vpack.c.bf16 %v216_v32, %v215_v31  ;;  %v218_v44 = vld [vmem:[%s1153_s3 + $0x38] sm:$0xff]  ;;  %v605_v54 = vld [vmem:[#allocation6] ss:$0 sm:$0xff]  ;;  %s573_s1 = sshll.u32 %s853_s30, 4  ;;  %s574_s1 = int_to_ptr.vmem [resolvable:$true] %s573_s1 }
  0x3a   :  { %698 = vmatpush3.bf16.msra.mxu0 %v697_v7  ;;  %vm74_vm8 = vcmp.eq.s32.totalorder %v71_v10, %v73_v16  ;;  %v83_v21 = vstv %s963_s15  ;;  %vm79_vm9 = vcmp.eq.s32.totalorder %v71_v10, %v78_v20  ;;  %v88_v24 = vstv %s971_s20  ;;  %704 = vmatpush3.bf16.msra.mxu1 %v703_v17  ;;  %v217_v43 = vld [vmem:[%s1153_s3 + $0x30] sm:$0xff]  ;;  %s851_s3 = smov 96   ;;  %v333_v7 = vld [vmem:[%s1155_s5] sm:$0xff]  ;;  %p819_p6 = scmp.lt.s32.totalorder %s574_s1, %s574_s1 }
  0x3b   :  { %699 = vmatprep.subr.bf16.mxu0 %v847_v4  ;;  %v588_v23 = vsel %vm74_vm8, 1.0, %v849_v11  ;;  %vm84_vm10 = vcmp.eq.s32.totalorder %v71_v10, %v83_v21  ;;  %v590_v25 = vsel %vm79_vm9, 1.0, %v849_v11  ;;  %vm89_vm11 = vcmp.eq.s32.totalorder %v71_v10, %v88_v24  ;;  %705 = vmatprep.subr.bf16.mxu1 %v847_v4  ;;  %v334_v8 = vld [vmem:[%s1155_s5 + $0x8] sm:$0xff]  ;;  %v335_v9 = vld [vmem:[%s1155_s5 + $0x10] sm:$0xff]  ;;  %v337_v14 = vld [vmem:[%s1155_s5 + $0x20] sm:$0xff] }
  0x3c   :  { %v592_v26 = vsel %vm84_vm10, 1.0, %v849_v11  ;;  %v93_v27 = vstv %s977_s21  ;;  %v594_v28 = vsel %vm89_vm11, 1.0, %v849_v11  ;;  %v113_v29 = vsel %vm112_vm0, %v588_v23, %v590_v25  ;;  %313 = vrot.lane.b32.xlu1 %v990_v13, %s851_s3  ;;  %s852_s21 = smov 64   ;;  %v338_v15 = vld [vmem:[%s1155_s5 + $0x28] sm:$0xff]  ;;  %v339_v17 = vld [vmem:[%s1155_s5 + $0x30] sm:$0xff] }
  0x3d   :  { %vm94_vm12 = vcmp.eq.s32.totalorder %v71_v10, %v93_v27  ;;  %v98_v30 = vstv %s979_s22  ;;  %v115_v33 = vsel %vm114_vm2, %v113_v29, %v592_v26  ;;  %v103_v36 = vstv %s981_s23  ;;  %v340_v18 = vld [vmem:[%s1155_s5 + $0x38] sm:$0xff]  ;;  %v608_v25 = vld [vmem:[#allocation7] ss:$0 sm:$0xff] }
  0x3e   :  { %701 = vmatpush3.bf16.msra.mxu0 %v700_v12  ;;  %v596_v35 = vsel %vm94_vm12, 1.0, %v849_v11  ;;  %vm99_vm13 = vcmp.eq.s32.totalorder %v71_v10, %v98_v30  ;;  %v117_v37 = vsel %vm116_vm3, %v115_v33, %v594_v28  ;;  %vm104_vm14 = vcmp.eq.s32.totalorder %v71_v10, %v103_v36  ;;  %707 = vmatpush3.bf16.msra.mxu1 %v706_v22 }
  0x3f   :  { %650 = vmatprep.subr.mxu0 %v849_v11  ;;  %v598_v38 = vsel %vm99_vm13, 1.0, %v849_v11  ;;  %v108_v39 = vstv %s983_s25  ;;  %v600_v40 = vsel %vm104_vm14, 1.0, %v849_v11  ;;  %v119_v41 = vsel %vm118_vm4, %v117_v37, %v596_v35  ;;  %708 = vmatprep.subr.bf16.mxu1 %v847_v4 }
  0x40   :  { %vm109_vm15 = vcmp.eq.s32.totalorder %v71_v10, %v108_v39  ;;  %v121_v46 = vsel %vm120_vm5, %v119_v41, %v598_v38  ;;  %vm133_vm0 = vcmask 408576   ;;  %v712_v49 = vpack.c.bf16 %v218_v44, %v217_v43  ;;  %v454_v38 = vld [vmem:[%s1157_s7 + $0x8] sm:$0xff]  ;;  %v456_v39 = vld [vmem:[%s1157_s7 + $0x18] sm:$0xff] }
  0x41   :  { %v602_v45 = vsel %vm109_vm15, 1.0, %v849_v11  ;;  %v123_v47 = vsel %vm122_vm6, %v121_v46, %v600_v40  ;;  %vm232_vm3 = vcmask 523264   ;;  %v715_v10 = vpack.c.bf16 %v334_v8, %v333_v7  ;;  %v453_v40 = vld [vmem:[%s1157_s7] sm:$0xff]  ;;  %v458_v43 = vld [vmem:[%s1157_s7 + $0x28] sm:$0xff]  ;;  %v460_v44 = vld [vmem:[%s1157_s7 + $0x38] sm:$0xff] }
  0x42   :  { %651 = vmatpush3.msk.msra.mxu0 %vm114_vm2, %v132_v34  ;;  %v125_v48 = vsel %vm124_vm7, %v123_v47, %v602_v45  ;;  %710 = vmatpush3.bf16.msra.mxu1 %v709_v42  ;;  %vm224_vm2 = vcmask 261120   ;;  %v721_v16 = vpack.c.bf16 %v338_v15, %v337_v14  ;;  %v724_v20 = vpack.c.bf16 %v340_v18, %v339_v17  ;;  %v455_v42 = vld [vmem:[%s1157_s7 + $0x10] sm:$0xff]  ;;  %v457_v47 = vld [vmem:[%s1157_s7 + $0x20] sm:$0xff] }
  0x43   :  { %714 = vmatprep.subr.bf16.mxu0 %v847_v4  ;;  %653 = vmatmul.mubr.msk.f32.vlgmr.msra.gmra.mrb[0].mxu0 %vm133_vm0, %v125_v48  ;;  %v726_v41 = vpack.c.bf16 %v456_v39, %v454_v38  ;;  %v728_v45 = vpack.c.bf16 %v455_v42, %v453_v40  ;;  %v730_v46 = vpack.c.bf16 %v460_v44, %v458_v43  ;;  %v459_v48 = vld [vmem:[%s1157_s7 + $0x30] sm:$0xff] }
  0x44   :  { %711 = vmatprep.subr.bf16.mxu1 %v847_v4  ;;  %690 = vmatprep.mubr.msk.f32.mxu0 %vm848_vm1, %v849_v11  ;;  %vm564_vm1 = vcmask 785408  }
  0x45   :  { %716 = vmatpush3.bf16.msra.mxu0 %v715_v10 }
  0x46   :  { %713 = vmatpush3.bf16.msra.mxu1 %v712_v49  ;;  %717 = vmatprep.subr.bf16.mxu0 %v847_v4  ;;  %v732_v49 = vpack.c.bf16 %v459_v48, %v457_v47 }
  0x47   :  { %727 = vmatprep.subr.bf16.mxu1 %v726_v41 }
  0xaa   :  { %v222_v50 = vpop.permute.xlu0 %221 }
  0xae   :  { %v314_v1 = vpop.permute.xlu1 %313 }
 0x116   :  { %v206_v51 = vpop.f32.mrb[0].mxu0 }
 0x117   :  { %v225_v52 = vsel %vm224_vm2, %v206_v51, %v222_v50  ;;  %v654_v53 = vpop.f32.mrb[1].mxu0 }
 0x118   :  { %672 = vmatmul.mubr.msk.f32.vlgmr.msra.gmra.mrb[0].mxu1 %vm232_vm3, %v225_v52 }
 0x119   :  { %542 = vmatprep.mubr.f32.mxu1 %v849_v11  ;;  %v336_v11 = vld [vmem:[%s1155_s5 + $0x18] sm:$0xff]  ;;  %729 = vmatpush1.bf16.msra.mxu1 %v728_v45 }
 0x11a   :  { %v718_v12 = vpack.c.bf16 %v336_v11, %v335_v9  ;;  %731 = vmatprep.subr.bf16.mxu1 %v730_v46 }
 0x11c   :  { %719 = vmatpush3.bf16.msra.mxu0 %v718_v12 }
 0x11d   :  { %720 = vmatprep.subr.bf16.mxu0 %v847_v4  ;;  %733 = vmatpush1.bf16.msra.mxu1 %v732_v49 }
 0x120   :  { %722 = vmatpush3.bf16.msra.mxu0 %v721_v16 }
 0x121   :  { %723 = vmatprep.subr.bf16.mxu0 %v847_v4 }
 0x124   :  { %725 = vmatpush3.bf16.msra.mxu0 %v724_v20 }
 0x1eb   :  { %v302_v55 = vpop.f32.mrb[0].mxu1 }
 0x1ec   :  { %v303_v56 = vadd.f32 %v605_v54, %v302_v55  ;;  %v673_v57 = vpop.f32.mrb[1].mxu1 }
 0x1ee   :  { %744 = vtanh.f32 %v303_v56  ;;  %v607_v59 = vmul.f32 -1.442695, %v303_v56 }
 0x1f0   :  { %746 = vpow2.f32 %v607_v59 }
 0x1f8   :  { %v745_v58 = vpop.eup %744 }
 0x1f9   :  { %318 = vrot.lane.b32.xlu0 %v745_v58, %s852_s21 }
 0x1fa   :  { %v747_v60 = vpop.eup %746 }
 0x1fb   :  { %v309_v61 = vadd.f32 1.0, %v747_v60  ;;  %v464_v60 = vshrl.u32 %v70_v3, 7 }
 0x1fd   :  { %748 = vrcp.f32 %v309_v61  ;;  %v465_v61 = vsub.s32 0, %v464_v60 }
 0x207   :  { %v749_v62 = vpop.eup %748 }
 0x208   :  { %v316_v2 = vmul.f32 %v749_v62, %v314_v1 }
 0x26b   :  { %v319_v63 = vpop.permute.xlu0 %318 }
 0x26c   :  { %v321_v0 = vmul.f32 %v749_v62, %v319_v63  ;;  %v469_v63 = vsub.s32 1, %v464_v60 }
 0x26e   :  { %323 = vrot.lane.b32.xlu1 %v321_v0, %s850_s11 }
 0x2e0   :  { %v324_v5 = vpop.permute.xlu1 %323 }
 0x2e1   :  { %v1059_v6 = vadd.f32 %v324_v5, %v316_v2 }
 0x2e3   :  { %750 = vtanh.f32 %v1059_v6 }
 0x2ed   :  { %v751_v19 = vpop.eup %750 }
 0x2ee   :  { %329 = vrot.lane.b32.xlu0 %v751_v19, %s852_s21 }
 0x360   :  { %v330_v21 = vpop.permute.xlu0 %329 }
 0x361   :  { %v332_v22 = vmul.f32 %v749_v62, %v330_v21  ;;  %v461_v62 = vld [vmem:[%s1158_s8] sm:$0x3] }
 0x362   :  { %v466_v0 = vrot.slane %v461_v62, %v465_v61  ;;  %v470_v1 = vrot.slane %v461_v62, %v469_v63 }
 0x363   :  { %343 = vrot.lane.b32.xlu1 %v332_v22, %s850_s11 }
 0x367   :  { %433 = vrot.lane.b32.xlu1 %v990_v13, %s852_s21 }
 0x3d5   :  { %v344_v23 = vpop.permute.xlu1 %343 }
 0x3d6   :  { %v346_v24 = vsel %vm224_vm2, %v344_v23, %v990_v13 }
 0x3d7   :  { %691 = vmatmul.mubr.msk.f32.vlgmr.msra.gmra.mrb[2].mxu0 %vm232_vm3, %v346_v24 }
 0x3d9   :  { %v434_v13 = vpop.permute.xlu1 %433 }
 0x4aa   :  { %v422_v26 = vpop.f32.mrb[2].mxu0 }
 0x4ab   :  { %v423_v27 = vadd.f32 %v608_v25, %v422_v26  ;;  %v692_v28 = vpop.f32.mrb[3].mxu0 }
 0x4ad   :  { %752 = vtanh.f32 %v423_v27  ;;  %v610_v29 = vmul.f32 -1.442695, %v423_v27 }
 0x4af   :  { %754 = vpow2.f32 %v610_v29 }
 0x4b7   :  { %v753_v4 = vpop.eup %752 }
 0x4b8   :  { %438 = vrot.lane.b32.xlu0 %v753_v4, %s852_s21 }
 0x4b9   :  { %v755_v30 = vpop.eup %754 }
 0x4ba   :  { %v429_v31 = vadd.f32 1.0, %v755_v30 }
 0x4bc   :  { %756 = vrcp.f32 %v429_v31 }
 0x4c6   :  { %v757_v32 = vpop.eup %756 }
 0x4c7   :  { %v436_v35 = vmul.f32 %v757_v32, %v434_v13 }
 0x52a   :  { %v439_v33 = vpop.permute.xlu0 %438 }
 0x52b   :  { %v441_v34 = vmul.f32 %v757_v32, %v439_v33 }
 0x52d   :  { %443 = vrot.lane.b32.xlu0 %v441_v34, %s850_s11 }
 0x59f   :  { %v444_v36 = vpop.permute.xlu0 %443 }
 0x5a0   :  { %v446_v37 = vadd.f32 %v444_v36, %v436_v35 }
 0x5a2   :  { %758 = vtanh.f32 %v446_v37 }
 0x5ac   :  { %v759_v50 = vpop.eup %758 }
 0x5ad   :  { %449 = vrot.lane.b32.xlu1 %v759_v50, %s852_s21 }
 0x61f   :  { %v450_v51 = vpop.permute.xlu1 %449 }
 0x620   :  { %v452_v52 = vmul.f32 %v757_v32, %v450_v51 }
 0x622   :  { %551 = vrot.lane.b32.xlu1 %v452_v52, %s852_s21  ;;  %474 = vrot.lane.b32.xlu0 %v452_v52, %s850_s11 }
 0x626   :  { %559 = vrot.lane.b32.xlu1 %v446_v37, %s852_s21  ;;  %555 = vrot.lane.b32.xlu0 %v1059_v6, %s850_s11 }
 0x694   :  { %v552_v53 = vpop.permute.xlu1 %551  ;;  %v475_v54 = vpop.permute.xlu0 %474 }
 0x695   :  { %611 = vmatmul.mubr.msk.f32.vlgmr.msra.gmra.mrb[2].mxu1 %vm224_vm2, %v475_v54  ;;  %v562_v55 = vsel %vm224_vm2, %v344_v23, %v552_v53 }
 0x698   :  { %v560_v56 = vpop.permute.xlu1 %559  ;;  %v556_v57 = vpop.permute.xlu0 %555 }
 0x699   :  { %v563_v58 = vsel %vm232_vm3, %v562_v55, %v556_v57 }
 0x69a   :  { %v565_v59 = vsel %vm564_vm1, %v563_v58, %v560_v56 }
 0x69b   :  { %566 = vst [vmem:[%s1160_s10] sm:$0xff] %v565_v59  ;;  %s814_s10 = scalar_lea.vmem %s574_s1, 256 }
 0x69c   :  { %p815_p5 = scmp.ne.s32.totalorder %s574_s1, %s814_s10  ;;  %p820_p7 = scmp.lt.s32.totalorder %s814_s10, %s814_s10 }
 0x69e   :  { %p821_p8 = por %p820_p7, %p819_p6 }
 0x6a0   :  { %p822_p9 = pnand %p821_p8, %p815_p5 }
 0x768   :  { %v544_v2 = vpop.f32.mrb[2].mxu1 }
 0x769   :  { %v545_v5 = vadd.f32 %v544_v2, %v466_v0  ;;  %v546_v6 = vpop.f32.mrb[3].mxu1 }
 0x76a   :  { %v547_v7 = vadd.f32 %v546_v6, %v470_v1 }
 0x76b   :  { %549 = vst [vmem:[#allocation9] sm:$0xff] %v545_v5 }
 0x76c   :  { %550 = vst [vmem:[#allocation9 + $0x8] sm:$0xff] %v547_v7 }
 0x76d   :  { %825 = shalt.err (!%p822_p9)
}
 0x76e   :  { %s826_s13 = scalar_lea.hbm %s1159_s9, 256 }
 0x76f   :  { %p827_p10 = scmp.ne.s32.totalorder %s1159_s9, %s826_s13  ;;  %p830_p11 = scmp.lt.u32.totalorder %s826_s13, %s1159_s9 }
 0x771   :  { %p832_p12 = pnand %p830_p11, %p827_p10 }
 0x773   :  { %835 = shalt.err (!%p832_p12)
}
 0x774   :  { %576 = dma.vmem_to_hbm [thread:$0]  %s574_s1, 256, %s1159_s9, [#allocation4]  }
 0x775   :  { %842 = dma.done.wait [#allocation4], 256  }
 0x776   :  { %843 = vsyncadd [#allocation4], 4294967040 }
 0x777   :  { %584 = vsyncpa [#allocation3], 1 }
 0x778   :  { %585 = vsyncpa [#allocation8], 1 }
 0x779   :  { %586 = vsyncpa [#allocation4], 1 }
 0x77a   :  { %587 = vsyncpa [#allocation5], 1 }

</bundles_post_ra>
